<compile_context>
chip_gen: v5e
topology: v5e:2x2
jax: 0.10.0
libtpu: 0.0.40
codegen_flags: <defaults>
</compile_context>

<pallas_src>
import math

import jax
import jax.numpy as jnp
from jax.experimental import pallas as pl
from jax.experimental.pallas import tpu as pltpu

_LANE = 128
_TARGET_BLOCK_BYTES = 2 * 1024 * 1024  # ~2 MiB per input block


def _drop_path_kernel(scale_ref, x_ref, o_ref):
    # scale_ref: (B,) float32 in SMEM (whole array, scalar-indexed).
    # x_ref / o_ref: (1, TR, Cb) VMEM tile of the current batch sample.
    b = pl.program_id(0)
    s = scale_ref[b].astype(x_ref.dtype)   # 0 or 1/keep_prob, in x.dtype
    o_ref[...] = x_ref[...] * s            # single VPU mul per vreg


def _pick_row_tile(rows: int, lane_width: int, itemsize: int) -> int:
    """Row-tile size: multiple of 8 (or == rows), ~2 MiB blocks, and when it is
    cheap, a divisor of `rows` so the last tile is not a ragged/masked store."""
    if rows <= 8:
        return rows                                    # == full dim, always legal
    target = max(8, (_TARGET_BLOCK_BYTES // (lane_width * itemsize)) // 8 * 8)
    tr = min(rows, target)
    if rows % tr == 0:
        return tr
    # Prefer an even divisor of rows if we don't lose more than ~2x block size.
    for cand in range(tr - tr % 8, max(8, tr // 2) - 1, -8):
        if cand > 0 and rows % cand == 0:
            return cand
    return tr                                          # accept one ragged tail tile


def drop_path(x, drop_prob: float = 0.0, *, training: bool = False, key=None):
    """JAX/Pallas equivalent of drop_path_f(x, drop_prob, training)."""
    if drop_prob == 0.0 or not training:
        return x
    if key is None:
        raise ValueError("drop_path in training mode with drop_prob > 0 needs a PRNG key")

    keep_prob = 1.0 - drop_prob
    B = x.shape[0]
    orig_shape = x.shape
    M = math.prod(x.shape[1:]) if x.ndim > 1 else 1

    # Per-sample uniform draw (same role as torch.rand((B,1,...,1))), fused
    # with the keep/rescale computation into one tiny (B,) scale vector.
    rand = jax.random.uniform(key, (B,), dtype=jnp.float32)
    scale = jnp.floor(keep_prob + rand) * (1.0 / keep_prob)   # (B,) f32

    # Lane-dense re-layout of the per-sample activations.
    if M % _LANE == 0:
        R, Cb = M // _LANE, _LANE
    else:
        # TODO(synk): trailing size not a multiple of 128 -> masked
        # (non-lane-dense) stores on this fallback path.
        R, Cb = 1, M

    x2 = x.reshape(B, R, Cb)
    itemsize = jnp.dtype(x.dtype).itemsize
    tr = _pick_row_tile(R, Cb, itemsize)
    grid = (B, pl.cdiv(R, tr))

    out = pl.pallas_call(
        _drop_path_kernel,
        out_shape=jax.ShapeDtypeStruct((B, R, Cb), x.dtype),
        grid=grid,
        in_specs=[
            # Whole (B,) scale vector in SMEM, scalar-indexed in the kernel.
            pl.BlockSpec(memory_space=pltpu.MemorySpace.SMEM),
            # (1, TR, Cb) tile per (sample, row-tile) grid step.
            pl.BlockSpec((1, tr, Cb), lambda b, r: (b, r, 0)),
        ],
        out_specs=pl.BlockSpec((1, tr, Cb), lambda b, r: (b, r, 0)),
        input_output_aliases={1: 0},             # donate x's buffer to output
        compiler_params=pltpu.CompilerParams(
            dimension_semantics=("parallel", "parallel"),
            vmem_limit_bytes=32 * 1024 * 1024,
        ),
    )(scale, x2)
    return out.reshape(orig_shape)


if __name__ == "__main__":
    key = jax.random.PRNGKey(0)
    kx, kr = jax.random.split(key)

    B, L, C = 2, 64, 128
    drop_prob = 0.3
    keep_prob = 1.0 - drop_prob
    x = jax.random.normal(kx, (B, L, C), dtype=jnp.float32)

    # Pure-JAX reference (same RNG draw and same fused scale as the kernel).
    rand = jax.random.uniform(kr, (B,), dtype=jnp.float32)
    scale = (jnp.floor(keep_prob + rand) * (1.0 / keep_prob)).reshape(B, 1, 1)
    ref = x * scale

    # Training mode: stochastic per-sample drop + rescale.
    y = drop_path(x, drop_prob, training=True, key=kr)
    y = jax.block_until_ready(y)
    assert y.shape == x.shape and y.dtype == x.dtype
    assert jnp.allclose(y, ref, atol=1e-6, rtol=1e-6), "training-mode mismatch"

    # Eval mode / drop_prob == 0: identity (PyTorch short-circuit).
    y_eval = drop_path(x, drop_prob, training=False, key=kr)
    assert bool(jnp.all(y_eval == x)), "eval-mode mismatch"
    y_zero = drop_path(x, 0.0, training=True, key=kr)
    assert bool(jnp.all(y_zero == x)), "drop_prob=0 mismatch"

    # Fallback path: trailing size not a multiple of 128 (masked stores).
    x_odd = jax.random.normal(kx, (2, 8, 5), dtype=jnp.float32)
    rand_o = jax.random.uniform(kr, (2,), dtype=jnp.float32)
    scale_o = (jnp.floor(keep_prob + rand_o) * (1.0 / keep_prob)).reshape(2, 1, 1)
    y_odd = jax.block_until_ready(drop_path(x_odd, drop_prob, training=True, key=kr))
    assert jnp.allclose(y_odd, x_odd * scale_o, atol=1e-6, rtol=1e-6), "fallback mismatch"

    # bf16 path (same scale vector, multiply done in bf16 like the torch impl).
    x_bf = x.astype(jnp.bfloat16)
    y_bf = jax.block_until_ready(drop_path(x_bf, drop_prob, training=True, key=kr))
    assert y_bf.dtype == jnp.bfloat16
    assert jnp.allclose(y_bf.astype(jnp.float32),
                        (x_bf * scale.astype(jnp.bfloat16)).astype(jnp.float32),
                        atol=1e-2, rtol=1e-2), "bf16 mismatch"

    print("KERNEL_OK")
</pallas_src>

<mosaic_0001>
module attributes {stable_mosaic.version = 11 : i64} {
  func.func @_drop_path_kernel(%arg0: i32, %arg1: i32, %arg2: memref<2xf32, #tpu.memory_space<smem>>, %arg3: memref<1x64x128xf32, #tpu.memory_space<vmem>>, %arg4: memref<1x64x128xf32, #tpu.memory_space<vmem>>) attributes {dimension_semantics = [#tpu.dimension_semantics<parallel>, #tpu.dimension_semantics<parallel>], iteration_bounds = array<i64: 2, 1>, scalar_prefetch = 0 : i64, scratch_operands = 0 : i64, tpu.core_type = #tpu.core_type<tc>, window_params = [{transform_indices = @transform_0, window_bounds = array<i64: 2>}, {transform_indices = @transform_1, window_bounds = array<i64: 1, 64, 128>}, {transform_indices = @transform_2, window_bounds = array<i64: 1, 64, 128>}]} {
    %0 = arith.index_cast %arg0 : i32 to index
    %1 = memref.load %arg2[%0] : memref<2xf32, #tpu.memory_space<smem>>
    %c0 = arith.constant 0 : index
    %c0_0 = arith.constant 0 : index
    %c0_1 = arith.constant 0 : index
    %2 = vector.load %arg3[%c0, %c0_0, %c0_1] : memref<1x64x128xf32, #tpu.memory_space<vmem>>, vector<1x64x128xf32>
    %3 = vector.broadcast %1 : f32 to vector<1x64x128xf32>
    %4 = arith.mulf %2, %3 : vector<1x64x128xf32>
    %c0_2 = arith.constant 0 : index
    %c0_3 = arith.constant 0 : index
    %c0_4 = arith.constant 0 : index
    %5 = vector.load %arg4[%c0_2, %c0_3, %c0_4] : memref<1x64x128xf32, #tpu.memory_space<vmem>>, vector<1x64x128xf32>
    tpu.vector_store %arg4[%c0_2, %c0_3, %c0_4], %4 {strides = array<i32>} : memref<1x64x128xf32, #tpu.memory_space<vmem>>, vector<1x64x128xf32>,
    return
  }
  func.func @transform_0(%arg0: i32, %arg1: i32) -> i32 {
    %c0_i32 = arith.constant 0 : i32
    %c0_i32_0 = arith.constant 0 : i32
    return %c0_i32 : i32
  }
  func.func @transform_1(%arg0: i32, %arg1: i32) -> (i32, i32, i32) {
    %c0_i32 = arith.constant 0 : i32
    %c0_i32_0 = arith.constant 0 : i32
    return %arg0, %arg1, %c0_i32 : i32, i32, i32
  }
  func.func @transform_2(%arg0: i32, %arg1: i32) -> (i32, i32, i32) {
    %c0_i32 = arith.constant 0 : i32
    %c0_i32_0 = arith.constant 0 : i32
    return %arg0, %arg1, %c0_i32 : i32, i32, i32
  }
}

</mosaic_0001>

<bundles_post_ra>
// kernel: tpu_custom_call.1
= control target key start
LH: loop header
LB: loop body
LE: loop exit
PB: predicated region body
PF: predicated region fallthrough
CT: control target
= control target key end

     0   :  { %7 = vsyncpa [#allocation5], 0  ;;  %s742_s0 = inlined_call_operand.vmem [shape: f32[2], index: 0, kind: input, shape index: {}]   ;;  %s743_s1 = inlined_call_operand.hbm [shape: f32[2,64,128], index: 1, kind: input, shape index: {}, may-alias: {1,2}]   ;;  %s744_s2 = inlined_call_operand.hbm [shape: f32[2,64,128], index: 2, kind: output, shape index: {}, may-alias: {1,2}]  }
   0x1   :  { %8 = vsyncpa [#allocation3], 0 }
   0x2   :  { %10 = vsyncpa [#allocation3 + $0x1], 0 }
   0x3   :  { %11 = vsyncpa [#allocation4], 0 }
   0x4   :  { %13 = vsyncpa [#allocation4 + $0x1], 0  ;;  %s590_s9 = smov 0   ;;  %s592_s10 = smov 0  }
   0x5   :  { %s594_s11 = smov 0   ;;  %s596_s12 = smov 0  }
   0x6   :  { %s598_s13 = smov 0   ;;  %s600_s14 = smov 0  }
   0x7 LB: > { %s341_s15 = sadd.s32 4294967295, %s568_s14   ;;  %s342_s16 = sadd.s32 4294967294, %s568_s14   ;;  %s568_s14 = sphi %s600_s14, %s19_s14   ;;  %s564_s13 = sphi %s598_s13, %s756_s13   ;;  %s560_s12 = sphi %s596_s12, %s755_s12   ;;  %s556_s11 = sphi %s594_s11, %s754_s11   ;;  %s552_s10 = sphi %s592_s10, %s753_s10   ;;  %s548_s9 = sphi %s590_s9, %s752_s9  }
   0x8   : > { %s61_s17 = sadd.s32 1, %s556_s11  ;;  %p68_p0 = scmp.ne.s32.totalorder %s556_s11, %s552_s10 }
   0x9   : > { %p69_p1 = scmp.eq.s32.totalorder %s568_s14, 0  ;;  %p74_p2 = scmp.ne.s32.totalorder %s552_s10, %s548_s9 }
   0xa   : > { %p628_p3 = scmp.eq.s32.totalorder %s341_s15, 0  ;;  %p100_p4 = scmp.eq.s32.totalorder %s341_s15, 1 }
   0xb   : > { %p632_p5 = por %p69_p1, %p68_p0  ;;  %p106_p6 = scmp.eq.s32.totalorder %s342_s16, 1 }
   0xc   : > { %p638_p7 = por %p628_p3, %p74_p2  ;;  %p642_p8 = por %p100_p4, %p68_p0 }
   0xd   : > { %p646_p9 = por %p106_p6, %p74_p2  ;;  %p343_p10 = scmp.ge.s32.totalorder %s568_s14, 1 }
   0xe   : > { %p113_p11 = scmp.lt.s32.totalorder %s568_s14, 3  ;;  %s125_s25 = sshll.u32 %s742_s0, 4  ;;  %s126_s25 = int_to_ptr.vmem [resolvable:$true] %s125_s25 }
   0xf   : > { %p345_p13 = scmp.ge.s32.totalorder %s568_s14, 2  ;;  %p381_p0 = scmp.lt.s32.totalorder %s568_s14, 2 }
  0x10   : > { %p655_p12 = pnand %p343_p10, %p113_p11  ;;  %s31_s28 = sadd.s32 1, %s564_s13 }
  0x11   : > { %p665_p2 = pnand %p381_p0, %p632_p5  ;;  %p33_p6 = scmp.ge.s32.totalorder %s31_s28, 2 }
  0x12   : > { %p368_p1 = pneg %p655_p12  ;;  %s136_s29 = sand.u32 1, %s556_s11  }
  0x13   : > { %s570_s30 = smov [#allocation2]   ;;  %s758_s28 = smov (%p33_p6, %s31_s28), 0 }
  0x14   : > { %p369_p4 = pnand %p368_p1, %p628_p3  ;;  %s346_s3 = sshll.u32 %s136_s29, 6 }
  0x15   : > { %s56_s4 = ssub.s32 %s564_s13, %s758_s28  ;;  %s358_s5 = sshll.u32 %s564_s13, 6 }
  0x16   : > { %371 = dma.vmem_to_smem (!%p369_p4), %s126_s25, 16, %s570_s30, [#allocation5]  }
  0x17   : > { %p59_p10 = scmp.eq.s32.totalorder %s56_s4, 0  ;;  %s147_s8 = scalar_lea.hbm %s743_s1, %s358_s5 }
  0x18   : > { %s140_s15 = scalar_lea.vmem [#allocation6], %s346_s3  ;;  %s148_s23 = sshll.u32 %s147_s8, 4  ;;  %s149_s23 = int_to_ptr.hbm [resolvable:$true] %s148_s23 }
  0x19   : > { %s150_s16 = sshll.u32 %s140_s15, 4  ;;  %s137_s24 = scalar_lea.sflag [#allocation3], %s136_s29  ;;  %s151_s16 = int_to_ptr.vmem [resolvable:$true] %s150_s16 }
  0x1a   : > { %s684_s19 = scalar_select %p59_p10, %s556_s11, %s61_s17  }
  0x1b   : > { %s571_s25 = smov 128   ;;  %s572_s30 = smov 8  }
  0x1c   : > { %375 = dma.hbm_to_vmem [thread:$0]  (!%p665_p2), %s149_s23, 1024, %s151_s16, %s137_s24, %s571_s25, %s571_s25, %s572_s30  }
  0x1d   : > { %162 = sbr.rel (%p655_p12) target bundleno = 61 (0x3d), region = 28 }
  0x22   : > { %535 = dma.done.wait (%p628_p3), [#allocation5], 16  }
  0x23   : > { %537 = vsyncadd (%p628_p3), [#allocation5], 4294967280  ;;  %s695_s17 = sand.u32 1, %s552_s10  }
  0x24   : > { %s351_s29 = sshll.u32 %s695_s17, 6  ;;  %s170_s3 = scalar_lea.sflag [#allocation3], %s695_s17 }
  0x25   : > { %s173_s4 = scalar_lea.vmem [#allocation6], %s351_s29 }
  0x26   : > { %539 = dma.done.wait (%p638_p7), %s170_s3, 1024  }
  0x27   : > { %541 = vsyncadd (%p638_p7), %s170_s3, 4294966272 }
  0x28   : > { %179 = sfence }
  0x29   : > { %s198_s26 = sld [smem:[#allocation2 + %s560_s12]]  ;;  %v199_v0 = vld [vmem:[%s173_s4] sm:$0xff]  ;;  %v200_v1 = vld [vmem:[%s173_s4 + $0x8] sm:$0xff]  ;;  %v201_v2 = vld [vmem:[%s173_s4 + $0x10] sm:$0xff]  ;;  %s359_s18 = sshll.u32 %s560_s12, 6 }
  0x2a   : > { %v202_v3 = vld [vmem:[%s173_s4 + $0x18] sm:$0xff]  ;;  %v203_v5 = vld [vmem:[%s173_s4 + $0x20] sm:$0xff]  ;;  %v204_v9 = vld [vmem:[%s173_s4 + $0x28] sm:$0xff]  ;;  %s238_s5 = scalar_lea.hbm %s744_s2, %s359_s18  ;;  %s195_s6 = scalar_lea.vmem [#allocation7], %s351_s29 }
  0x2b   : > { %v205_v11 = vld [vmem:[%s173_s4 + $0x30] sm:$0xff]  ;;  %v206_v13 = vld [vmem:[%s173_s4 + $0x38] sm:$0xff]  ;;  %s239_s7 = sshll.u32 %s195_s6, 4  ;;  %s241_s12 = sshll.u32 %s238_s5, 4  ;;  %s240_s7 = int_to_ptr.vmem [resolvable:$true] %s239_s7  ;;  %s242_s12 = int_to_ptr.hbm [resolvable:$true] %s241_s12 }
  0x2c   : > { %s225_s8 = scalar_lea.sflag [#allocation4], %s695_s17  ;;  %s496_s15 = sshra.s32 %s242_s12, 4  ;;  %s497_s15 = int_to_ptr.hbm [resolvable:$true] %s496_s15 }
  0x2d   : > { %s498_s16 = scalar_lea.hbm %s497_s15, 64  ;;  %s502_s25 = scalar_lea.hbm %s744_s2, 128 }
  0x2e   : > { %p499_p3 = scmp.ne.s32.totalorder %s497_s15, %s498_s16  ;;  %p503_p11 = scmp.lt.s32.totalorder %s497_s15, %s744_s2 }
  0x2f   : > { %v207_v4 = vstv %s198_s26  ;;  %p504_p12 = scmp.lt.s32.totalorder %s502_s25, %s498_s16 }
  0x30   : > { %v208_v6 = vmul.f32 %v207_v4, %v199_v0  ;;  %v209_v7 = vmul.f32 %v207_v4, %v200_v1  ;;  %v210_v8 = vmul.f32 %v207_v4, %v201_v2  ;;  %v211_v10 = vmul.f32 %v207_v4, %v202_v3  ;;  %p500_p5 = pnand %p499_p3, %p642_p8 }
  0x31   : > { %v212_v12 = vmul.f32 %v207_v4, %v203_v5  ;;  %v213_v14 = vmul.f32 %v207_v4, %v204_v9  ;;  %v214_v15 = vmul.f32 %v207_v4, %v205_v11  ;;  %v215_v16 = vmul.f32 %v207_v4, %v206_v13  ;;  %p505_p0 = por %p504_p12, %p503_p11 }
  0x32   : > { %216 = vst [vmem:[%s195_s6] sm:$0xff] %v208_v6  ;;  %p501_p7 = pneg %p500_p5 }
  0x33   : > { %217 = vst [vmem:[%s195_s6 + $0x8] sm:$0xff] %v209_v7 }
  0x34   : > { %218 = vst [vmem:[%s195_s6 + $0x10] sm:$0xff] %v210_v8  ;;  %p506_p1 = pnand %p505_p0, %p501_p7 }
  0x35   : > { %219 = vst [vmem:[%s195_s6 + $0x18] sm:$0xff] %v211_v10 }
  0x36   : > { %220 = vst [vmem:[%s195_s6 + $0x20] sm:$0xff] %v212_v12 }
  0x37   : > { %221 = vst [vmem:[%s195_s6 + $0x28] sm:$0xff] %v213_v14 }
  0x38   : > { %222 = vst [vmem:[%s195_s6 + $0x30] sm:$0xff] %v214_v15 }
  0x39   : > { %223 = vst [vmem:[%s195_s6 + $0x38] sm:$0xff] %v215_v16 }
  0x3a   : > { %509 = shalt.err (!%p506_p1)
}
  0x3b   : > { %s573_s17 = smov 128   ;;  %s574_s3 = smov 8  }
  0x3c   : > { %366 = dma.vmem_to_hbm [thread:$0]  (%p642_p8), %s240_s7, 1024, %s242_s12, %s225_s8, %s573_s17, %s573_s17, %s574_s3  }
  0x3d PF: > { %s256_s4 = sand.u32 1, %s548_s9   ;;  %p377_p2 = pnand %p345_p13, %p646_p9 }
  0x3e   : > { %s257_s26 = scalar_lea.sflag [#allocation4], %s256_s4 }
  0x3f   : > { %p378_p4 = pneg %p377_p2 }
  0x41   : > { %543 = dma.done.wait (%p378_p4), %s257_s26, 1024  }
  0x42   : > { %545 = vsyncadd (%p378_p4), %s257_s26, 4294966272  ;;  %s19_s14 = sadd.s32 1, %s568_s14   ;;  %s752_s9 = smov %s552_s10 }
  0x43   : > { %p16_p6 = scmp.ge.s32.totalorder %s19_s14, 4   ;;  %s753_s10 = smov %s556_s11 }
  0x44   : > { %s754_s11 = smov %s684_s19  ;;  %s755_s12 = smov %s564_s13 }
  0x45   : > { %s756_s13 = smov %s758_s28  ;;  %18 = sbr.rel (!%p16_p6) target bundleno = 7 (0x7), region = 78 }
  0x4a   :  { %263 = vsyncpa [#allocation3], 1 }
  0x4b   :  { %265 = vsyncpa [#allocation3 + $0x1], 1 }
  0x4c   :  { %266 = vsyncpa [#allocation4], 1 }
  0x4d   :  { %268 = vsyncpa [#allocation4 + $0x1], 1 }
  0x4e   :  { %269 = vsyncpa [#allocation5], 1 }
  0x4f   :  { %271 = vsyncpa [#allocation5 + $0x1], 1 }

</bundles_post_ra>
